<compile_context>
chip_gen: v7x
topology: tpu7x:2x2x1
jax: 0.10.0
libtpu: 0.0.40
codegen_flags: <defaults>
</compile_context>

<pallas_src>
import math

import jax
import jax.numpy as jnp
from jax.experimental import pallas as pl
from jax.experimental.pallas import tpu as pltpu


# ----------------------------- in-kernel helpers -----------------------------

def _mm(a, w):
    # bf16 MXU inputs, f32 accumulation.
    return jnp.dot(a.astype(jnp.bfloat16), w.astype(jnp.bfloat16),
                   preferred_element_type=jnp.float32)


def _mha_core(q, k, v, mask_add, num_heads, scale):
    """Per-head scaled-dot-product attention.  q:(Sq,D)  k,v:(Sk,D) -> (Sq,D)."""
    D = q.shape[-1]
    Dh = D // num_heads
    ctx = []
    for h in range(num_heads):                       # static unroll (small H)
        sl = slice(h * Dh, (h + 1) * Dh)
        qh = q[:, sl].astype(jnp.bfloat16)
        kh = k[:, sl].astype(jnp.bfloat16)
        vh = v[:, sl].astype(jnp.bfloat16)
        # contract over Dh directly (no explicit k transpose / XLU vxpose)
        s = jax.lax.dot_general(qh, kh, (((1,), (1,)), ((), ())),
                                preferred_element_type=jnp.float32) * scale
        if mask_add is not None:
            s = s + mask_add
        s = s - jnp.max(s, axis=-1, keepdims=True)
        p = jnp.exp(s)
        p = p * pl.reciprocal(jnp.sum(p, axis=-1, keepdims=True), approx=True)
        ctx.append(jnp.dot(p.astype(jnp.bfloat16), vh,
                           preferred_element_type=jnp.float32))
    return jnp.concatenate(ctx, axis=-1)             # (Sq, D)


def _add_layernorm(x, y, gamma, beta, eps):
    z = x + y                                        # f32 residual
    mu = jnp.mean(z, axis=-1, keepdims=True)
    var = jnp.mean((z - mu) ** 2, axis=-1, keepdims=True)
    return (z - mu) * jax.lax.rsqrt(var + eps) * gamma + beta


# ------------------------------- fused kernels --------------------------------

def _make_self_attn_kernel(has_mask, num_heads, scale, eps):
    def kernel(*refs):
        if has_mask:
            (x_ref, wqkv_ref, bqkv_ref, wo_ref, bo_ref,
             g_ref, b_ref, mask_ref, o_ref) = refs
            mask = mask_ref[...]
        else:
            (x_ref, wqkv_ref, bqkv_ref, wo_ref, bo_ref,
             g_ref, b_ref, o_ref) = refs
            mask = None
        x = x_ref[...]                               # (S, D) f32
        D = x.shape[-1]
        qkv = _mm(x, wqkv_ref[...]) + bqkv_ref[...]  # fused QKV: one (S,3D) matmul
        q, k, v = qkv[:, :D], qkv[:, D:2 * D], qkv[:, 2 * D:]
        ctx = _mha_core(q, k, v, mask, num_heads, scale)
        attn = _mm(ctx, wo_ref[...]) + bo_ref[...]
        o_ref[...] = _add_layernorm(x, attn, g_ref[...], b_ref[...], eps)
    return kernel


def _make_cross_attn_kernel(has_mask, num_heads, scale, eps):
    def kernel(*refs):
        if has_mask:
            (x_ref, enc_ref, wq_ref, bq_ref, wkv_ref, bkv_ref,
             wo_ref, bo_ref, g_ref, b_ref, mask_ref, o_ref) = refs
            mask = mask_ref[...]
        else:
            (x_ref, enc_ref, wq_ref, bq_ref, wkv_ref, bkv_ref,
             wo_ref, bo_ref, g_ref, b_ref, o_ref) = refs
            mask = None
        x = x_ref[...]                               # (St, D)
        enc = enc_ref[...]                           # (Ss, D)
        D = x.shape[-1]
        q = _mm(x, wq_ref[...]) + bq_ref[...]        # (St, D)
        kv = _mm(enc, wkv_ref[...]) + bkv_ref[...]   # fused KV: one (Ss,2D) matmul
        k, v = kv[:, :D], kv[:, D:]
        ctx = _mha_core(q, k, v, mask, num_heads, scale)
        attn = _mm(ctx, wo_ref[...]) + bo_ref[...]
        o_ref[...] = _add_layernorm(x, attn, g_ref[...], b_ref[...], eps)
    return kernel


def _make_ffn_kernel(eps):
    def kernel(x_ref, w1_ref, b1_ref, w2_ref, b2_ref, g_ref, b_ref, o_ref):
        x = x_ref[...]                               # (S, D)
        h = _mm(x, w1_ref[...]) + b1_ref[...]
        h = jnp.maximum(h, 0.0)
        ff = _mm(h, w2_ref[...]) + b2_ref[...]
        o_ref[...] = _add_layernorm(x, ff, g_ref[...], b_ref[...], eps)
    return kernel


# ------------------------------ pallas_call wrappers ---------------------------

def _resident(shape):
    # Weight / bias / LN-param block: same block for every grid step (stays resident).
    return pl.BlockSpec(shape, lambda b: (0,) * len(shape))


def self_attention_block(x, p, gamma, beta, mask_add, num_heads, eps=1e-5):
    B, S, D = x.shape
    scale = 1.0 / math.sqrt(D // num_heads)
    has_mask = mask_add is not None
    kern = _make_self_attn_kernel(has_mask, num_heads, scale, eps)

    inputs = [x, p["wqkv"], p["bqkv"].reshape(1, 3 * D),
              p["wo"], p["bo"].reshape(1, D),
              gamma.reshape(1, D), beta.reshape(1, D)]
    in_specs = [
        pl.BlockSpec((None, S, D), lambda b: (b, 0, 0)),
        _resident((D, 3 * D)),
        _resident((1, 3 * D)),
        _resident((D, D)),
        _resident((1, D)),
        _resident((1, D)),
        _resident((1, D)),
    ]
    if has_mask:
        inputs.append(mask_add)
        in_specs.append(_resident((S, S)))

    return pl.pallas_call(
        kern,
        out_shape=jax.ShapeDtypeStruct((B, S, D), jnp.float32),
        grid=(B,),
        in_specs=in_specs,
        out_specs=pl.BlockSpec((None, S, D), lambda b: (b, 0, 0)),
        compiler_params=pltpu.CompilerParams(dimension_semantics=("parallel",)),
    )(*inputs)


def cross_attention_block(x, enc, p, gamma, beta, mask_add, num_heads, eps=1e-5):
    B, St, D = x.shape
    Ss = enc.shape[1]
    scale = 1.0 / math.sqrt(D // num_heads)
    has_mask = mask_add is not None
    kern = _make_cross_attn_kernel(has_mask, num_heads, scale, eps)

    inputs = [x, enc,
              p["wq"], p["bq"].reshape(1, D),
              p["wkv"], p["bkv"].reshape(1, 2 * D),
              p["wo"], p["bo"].reshape(1, D),
              gamma.reshape(1, D), beta.reshape(1, D)]
    in_specs = [
        pl.BlockSpec((None, St, D), lambda b: (b, 0, 0)),
        pl.BlockSpec((None, Ss, D), lambda b: (b, 0, 0)),
        _resident((D, D)),
        _resident((1, D)),
        _resident((D, 2 * D)),
        _resident((1, 2 * D)),
        _resident((D, D)),
        _resident((1, D)),
        _resident((1, D)),
        _resident((1, D)),
    ]
    if has_mask:
        inputs.append(mask_add)
        in_specs.append(_resident((St, Ss)))

    return pl.pallas_call(
        kern,
        out_shape=jax.ShapeDtypeStruct((B, St, D), jnp.float32),
        grid=(B,),
        in_specs=in_specs,
        out_specs=pl.BlockSpec((None, St, D), lambda b: (b, 0, 0)),
        compiler_params=pltpu.CompilerParams(dimension_semantics=("parallel",)),
    )(*inputs)


def ffn_block(x, w1, b1, w2, b2, gamma, beta, eps=1e-5):
    B, S, D = x.shape
    F = w1.shape[1]
    kern = _make_ffn_kernel(eps)
    return pl.pallas_call(
        kern,
        out_shape=jax.ShapeDtypeStruct((B, S, D), jnp.float32),
        grid=(B,),
        in_specs=[
            pl.BlockSpec((None, S, D), lambda b: (b, 0, 0)),
            _resident((D, F)),
            _resident((1, F)),
            _resident((F, D)),
            _resident((1, D)),
            _resident((1, D)),
            _resident((1, D)),
        ],
        out_specs=pl.BlockSpec((None, S, D), lambda b: (b, 0, 0)),
        compiler_params=pltpu.CompilerParams(dimension_semantics=("parallel",)),
    )(x, w1, b1.reshape(1, F), w2, b2.reshape(1, D),
      gamma.reshape(1, D), beta.reshape(1, D))


# ------------------------------ decoder layer ----------------------------------

def decoder_layer_forward(params, x, enc_output, tgt_mask=None, memory_mask=None):
    """Mirrors DecoderLayer.forward (dropout == identity in eval mode)."""
    H = params["num_heads"]

    def to_additive(mask):
        if mask is None:
            return None
        return jnp.where(mask > 0, 0.0, -1e9).astype(jnp.float32)

    # self attention + residual + norm1   (one fused pallas_call)
    x = self_attention_block(x, params["self_attn"],
                             params["ln1_g"], params["ln1_b"],
                             to_additive(tgt_mask), H)
    # encoder-decoder attention + residual + norm2   (one fused pallas_call)
    x = cross_attention_block(x, enc_output, params["cross_attn"],
                              params["ln2_g"], params["ln2_b"],
                              to_additive(memory_mask), H)
    # feed forward + residual + norm3   (one fused pallas_call)
    x = ffn_block(x, params["w1"], params["b1"], params["w2"], params["b2"],
                  params["ln3_g"], params["ln3_b"])
    return x


# ------------------------------ parameter init ---------------------------------

def init_params(key, d_model, num_heads, d_ff):
    ks = jax.random.split(key, 10)

    def dense(k, fan_in, fan_out):
        w = jax.random.normal(k, (fan_in, fan_out), jnp.float32) * 0.02
        b = jnp.zeros((fan_out,), jnp.float32)
        return w, b

    # self-attention: fused QKV weight (D, 3D)
    wq, bq = dense(ks[0], d_model, d_model)
    wk, bk = dense(ks[1], d_model, d_model)
    wv, bv = dense(ks[2], d_model, d_model)
    wo, bo = dense(ks[3], d_model, d_model)
    self_attn = dict(wqkv=jnp.concatenate([wq, wk, wv], axis=1),
                     bqkv=jnp.concatenate([bq, bk, bv]),
                     wo=wo, bo=bo)

    # cross-attention: separate Q, fused KV weight (D, 2D)
    wq2, bq2 = dense(ks[4], d_model, d_model)
    wk2, bk2 = dense(ks[5], d_model, d_model)
    wv2, bv2 = dense(ks[6], d_model, d_model)
    wo2, bo2 = dense(ks[7], d_model, d_model)
    cross_attn = dict(wq=wq2, bq=bq2,
                      wkv=jnp.concatenate([wk2, wv2], axis=1),
                      bkv=jnp.concatenate([bk2, bv2]),
                      wo=wo2, bo=bo2)

    w1, b1 = dense(ks[8], d_model, d_ff)
    w2, b2 = dense(ks[9], d_ff, d_model)

    return dict(
        num_heads=num_heads,
        self_attn=self_attn,
        cross_attn=cross_attn,
        w1=w1, b1=b1, w2=w2, b2=b2,
        ln1_g=jnp.ones((d_model,), jnp.float32), ln1_b=jnp.zeros((d_model,), jnp.float32),
        ln2_g=jnp.ones((d_model,), jnp.float32), ln2_b=jnp.zeros((d_model,), jnp.float32),
        ln3_g=jnp.ones((d_model,), jnp.float32), ln3_b=jnp.zeros((d_model,), jnp.float32),
    )


# ------------------------------------ main --------------------------------------

if __name__ == "__main__":
    d_model, num_heads, d_ff = 32, 4, 64
    B, S_tgt, S_src = 2, 8, 8

    key = jax.random.PRNGKey(0)
    k_par, k_x, k_enc = jax.random.split(key, 3)

    params = init_params(k_par, d_model, num_heads, d_ff)
    x = jax.random.normal(k_x, (B, S_tgt, d_model), jnp.float32)
    enc_output = jax.random.normal(k_enc, (B, S_src, d_model), jnp.float32)

    # causal mask for self-attention (1 = keep, 0 = masked); no memory mask
    tgt_mask = jnp.tril(jnp.ones((S_tgt, S_tgt), jnp.float32))
    memory_mask = None

    out = decoder_layer_forward(params, x, enc_output, tgt_mask, memory_mask)
    out = jax.block_until_ready(out)

    assert out.shape == (B, S_tgt, d_model)
    assert bool(jnp.all(jnp.isfinite(out)))
    print("KERNEL_OK")
</pallas_src>

<mosaic_0001>
module attributes {stable_mosaic.version = 11 : i64} {
  func.func @kernel(%arg0: i32, %arg1: memref<1x8x32xf32, #tpu.memory_space<vmem>>, %arg2: memref<32x96xf32, #tpu.memory_space<vmem>>, %arg3: memref<1x96xf32, #tpu.memory_space<vmem>>, %arg4: memref<32x32xf32, #tpu.memory_space<vmem>>, %arg5: memref<1x32xf32, #tpu.memory_space<vmem>>, %arg6: memref<1x32xf32, #tpu.memory_space<vmem>>, %arg7: memref<1x32xf32, #tpu.memory_space<vmem>>, %arg8: memref<8x8xf32, #tpu.memory_space<vmem>>, %arg9: memref<1x8x32xf32, #tpu.memory_space<vmem>>) attributes {dimension_semantics = [#tpu.dimension_semantics<parallel>], iteration_bounds = array<i64: 2>, scalar_prefetch = 0 : i64, scratch_operands = 0 : i64, tpu.core_type = #tpu.core_type<tc>, window_params = [{transform_indices = @transform_0, window_bounds = array<i64: 1, 8, 32>}, {pipeline_mode = #tpu.pipeline_mode<synchronous>, transform_indices = @transform_1, window_bounds = array<i64: 32, 96>}, {pipeline_mode = #tpu.pipeline_mode<synchronous>, transform_indices = @transform_2, window_bounds = array<i64: 1, 96>}, {pipeline_mode = #tpu.pipeline_mode<synchronous>, transform_indices = @transform_3, window_bounds = array<i64: 32, 32>}, {pipeline_mode = #tpu.pipeline_mode<synchronous>, transform_indices = @transform_4, window_bounds = array<i64: 1, 32>}, {pipeline_mode = #tpu.pipeline_mode<synchronous>, transform_indices = @transform_5, window_bounds = array<i64: 1, 32>}, {pipeline_mode = #tpu.pipeline_mode<synchronous>, transform_indices = @transform_6, window_bounds = array<i64: 1, 32>}, {pipeline_mode = #tpu.pipeline_mode<synchronous>, transform_indices = @transform_7, window_bounds = array<i64: 8, 8>}, {transform_indices = @transform_8, window_bounds = array<i64: 1, 8, 32>}]} {
    %c0 = arith.constant 0 : index
    %c0_0 = arith.constant 0 : index
    %0 = vector.load %arg8[%c0, %c0_0] : memref<8x8xf32, #tpu.memory_space<vmem>>, vector<8x8xf32>
    %c0_1 = arith.constant 0 : index
    %c0_2 = arith.constant 0 : index
    %c0_3 = arith.constant 0 : index
    %1 = vector.load %arg1[%c0_1, %c0_2, %c0_3] : memref<1x8x32xf32, #tpu.memory_space<vmem>>, vector<1x8x32xf32>
    %2 = vector.shape_cast %1 : vector<1x8x32xf32> to vector<8x32xf32>
    %c0_4 = arith.constant 0 : index
    %c0_5 = arith.constant 0 : index
    %3 = vector.load %arg2[%c0_4, %c0_5] : memref<32x96xf32, #tpu.memory_space<vmem>>, vector<32x96xf32>
    %4 = arith.truncf %2 : vector<8x32xf32> to vector<8x32xbf16>
    %5 = arith.truncf %3 : vector<32x96xf32> to vector<32x96xbf16>
    %cst = arith.constant dense<0.000000e+00> : vector<8x96xf32>
    %6 = tpu.matmul %4, %5, %cst {dimension_numbers = #tpu.dot_dimension_numbers<[1], [0], [0], [1], [0, 0, 1, 1], [], []>} : vector<8x32xbf16>, vector<32x96xbf16>, vector<8x96xf32> -> vector<8x96xf32>
    %c0_6 = arith.constant 0 : index
    %c0_7 = arith.constant 0 : index
    %7 = vector.load %arg3[%c0_6, %c0_7] : memref<1x96xf32, #tpu.memory_space<vmem>>, vector<1x96xf32>
    %8 = vector.broadcast %7 : vector<1x96xf32> to vector<8x96xf32>
    %9 = arith.addf %6, %8 : vector<8x96xf32>
    %10 = vector.extract_strided_slice %9 {offsets = [0, 0], sizes = [8, 32], strides = [1, 1]} : vector<8x96xf32> to vector<8x32xf32>
    %11 = vector.extract_strided_slice %9 {offsets = [0, 32], sizes = [8, 32], strides = [1, 1]} : vector<8x96xf32> to vector<8x32xf32>
    %12 = vector.extract_strided_slice %9 {offsets = [0, 64], sizes = [8, 32], strides = [1, 1]} : vector<8x96xf32> to vector<8x32xf32>
    %13 = vector.extract_strided_slice %10 {offsets = [0, 0], sizes = [8, 8], strides = [1, 1]} : vector<8x32xf32> to vector<8x8xf32>
    %14 = arith.truncf %13 : vector<8x8xf32> to vector<8x8xbf16>
    %15 = vector.extract_strided_slice %11 {offsets = [0, 0], sizes = [8, 8], strides = [1, 1]} : vector<8x32xf32> to vector<8x8xf32>
    %16 = arith.truncf %15 : vector<8x8xf32> to vector<8x8xbf16>
    %17 = vector.extract_strided_slice %12 {offsets = [0, 0], sizes = [8, 8], strides = [1, 1]} : vector<8x32xf32> to vector<8x8xf32>
    %18 = arith.truncf %17 : vector<8x8xf32> to vector<8x8xbf16>
    %cst_8 = arith.constant dense<0.000000e+00> : vector<8x8xf32>
    %19 = tpu.matmul %14, %16, %cst_8 {dimension_numbers = #tpu.dot_dimension_numbers<[1], [1], [0], [0], [0, 0, 1, 0], [], []>} : vector<8x8xbf16>, vector<8x8xbf16>, vector<8x8xf32> -> vector<8x8xf32>
    %cst_9 = arith.constant 0.353553385 : f32
    %20 = vector.broadcast %cst_9 : f32 to vector<8x8xf32>
    %21 = arith.mulf %19, %20 : vector<8x8xf32>
    %22 = arith.addf %21, %0 : vector<8x8xf32>
    %cst_10 = arith.constant dense<0xFF800000> : vector<8xf32>
    %23 = vector.multi_reduction <maximumf>, %22, %cst_10 [1] : vector<8x8xf32> to vector<8xf32>
    %24 = vector.shape_cast %23 : vector<8xf32> to vector<8x1xf32>
    %25 = vector.broadcast %24 : vector<8x1xf32> to vector<8x8xf32>
    %26 = arith.subf %22, %25 : vector<8x8xf32>
    %27 = math.exp %26 : vector<8x8xf32>
    %cst_11 = arith.constant dense<0.000000e+00> : vector<8xf32>
    %28 = vector.multi_reduction <add>, %27, %cst_11 [1] : vector<8x8xf32> to vector<8xf32>
    %29 = vector.shape_cast %28 : vector<8xf32> to vector<8x1xf32>
    %30 = tpu.reciprocal %29 {approx = true} : vector<8x1xf32> -> vector<8x1xf32>
    %31 = vector.broadcast %30 : vector<8x1xf32> to vector<8x8xf32>
    %32 = arith.mulf %27, %31 : vector<8x8xf32>
    %33 = arith.truncf %32 : vector<8x8xf32> to vector<8x8xbf16>
    %cst_12 = arith.constant dense<0.000000e+00> : vector<8x8xf32>
    %34 = tpu.matmul %33, %18, %cst_12 {dimension_numbers = #tpu.dot_dimension_numbers<[1], [0], [0], [1], [0, 0, 1, 1], [], []>} : vector<8x8xbf16>, vector<8x8xbf16>, vector<8x8xf32> -> vector<8x8xf32>
    %35 = vector.extract_strided_slice %10 {offsets = [0, 8], sizes = [8, 8], strides = [1, 1]} : vector<8x32xf32> to vector<8x8xf32>
    %36 = arith.truncf %35 : vector<8x8xf32> to vector<8x8xbf16>
    %37 = vector.extract_strided_slice %11 {offsets = [0, 8], sizes = [8, 8], strides = [1, 1]} : vector<8x32xf32> to vector<8x8xf32>
    %38 = arith.truncf %37 : vector<8x8xf32> to vector<8x8xbf16>
    %39 = vector.extract_strided_slice %12 {offsets = [0, 8], sizes = [8, 8], strides = [1, 1]} : vector<8x32xf32> to vector<8x8xf32>
    %40 = arith.truncf %39 : vector<8x8xf32> to vector<8x8xbf16>
    %cst_13 = arith.constant dense<0.000000e+00> : vector<8x8xf32>
    %41 = tpu.matmul %36, %38, %cst_13 {dimension_numbers = #tpu.dot_dimension_numbers<[1], [1], [0], [0], [0, 0, 1, 0], [], []>} : vector<8x8xbf16>, vector<8x8xbf16>, vector<8x8xf32> -> vector<8x8xf32>
    %cst_14 = arith.constant 0.353553385 : f32
    %42 = vector.broadcast %cst_14 : f32 to vector<8x8xf32>
    %43 = arith.mulf %41, %42 : vector<8x8xf32>
    %44 = arith.addf %43, %0 : vector<8x8xf32>
    %cst_15 = arith.constant dense<0xFF800000> : vector<8xf32>
    %45 = vector.multi_reduction <maximumf>, %44, %cst_15 [1] : vector<8x8xf32> to vector<8xf32>
    %46 = vector.shape_cast %45 : vector<8xf32> to vector<8x1xf32>
    %47 = vector.broadcast %46 : vector<8x1xf32> to vector<8x8xf32>
    %48 = arith.subf %44, %47 : vector<8x8xf32>
    %49 = math.exp %48 : vector<8x8xf32>
    %cst_16 = arith.constant dense<0.000000e+00> : vector<8xf32>
    %50 = vector.multi_reduction <add>, %49, %cst_16 [1] : vector<8x8xf32> to vector<8xf32>
    %51 = vector.shape_cast %50 : vector<8xf32> to vector<8x1xf32>
    %52 = tpu.reciprocal %51 {approx = true} : vector<8x1xf32> -> vector<8x1xf32>
    %53 = vector.broadcast %52 : vector<8x1xf32> to vector<8x8xf32>
    %54 = arith.mulf %49, %53 : vector<8x8xf32>
    %55 = arith.truncf %54 : vector<8x8xf32> to vector<8x8xbf16>
    %cst_17 = arith.constant dense<0.000000e+00> : vector<8x8xf32>
    %56 = tpu.matmul %55, %40, %cst_17 {dimension_numbers = #tpu.dot_dimension_numbers<[1], [0], [0], [1], [0, 0, 1, 1], [], []>} : vector<8x8xbf16>, vector<8x8xbf16>, vector<8x8xf32> -> vector<8x8xf32>
    %57 = vector.extract_strided_slice %10 {offsets = [0, 16], sizes = [8, 8], strides = [1, 1]} : vector<8x32xf32> to vector<8x8xf32>
    %58 = arith.truncf %57 : vector<8x8xf32> to vector<8x8xbf16>
    %59 = vector.extract_strided_slice %11 {offsets = [0, 16], sizes = [8, 8], strides = [1, 1]} : vector<8x32xf32> to vector<8x8xf32>
    %60 = arith.truncf %59 : vector<8x8xf32> to vector<8x8xbf16>
    %61 = vector.extract_strided_slice %12 {offsets = [0, 16], sizes = [8, 8], strides = [1, 1]} : vector<8x32xf32> to vector<8x8xf32>
    %62 = arith.truncf %61 : vector<8x8xf32> to vector<8x8xbf16>
    %cst_18 = arith.constant dense<0.000000e+00> : vector<8x8xf32>
    %63 = tpu.matmul %58, %60, %cst_18 {dimension_numbers = #tpu.dot_dimension_numbers<[1], [1], [0], [0], [0, 0, 1, 0], [], []>} : vector<8x8xbf16>, vector<8x8xbf16>, vector<8x8xf32> -> vector<8x8xf32>
    %cst_19 = arith.constant 0.353553385 : f32
    %64 = vector.broadcast %cst_19 : f32 to vector<8x8xf32>
    %65 = arith.mulf %63, %64 : vector<8x8xf32>
    %66 = arith.addf %65, %0 : vector<8x8xf32>
    %cst_20 = arith.constant dense<0xFF800000> : vector<8xf32>
    %67 = vector.multi_reduction <maximumf>, %66, %cst_20 [1] : vector<8x8xf32> to vector<8xf32>
    %68 = vector.shape_cast %67 : vector<8xf32> to vector<8x1xf32>
    %69 = vector.broadcast %68 : vector<8x1xf32> to vector<8x8xf32>
    %70 = arith.subf %66, %69 : vector<8x8xf32>
    %71 = math.exp %70 : vector<8x8xf32>
    %cst_21 = arith.constant dense<0.000000e+00> : vector<8xf32>
    %72 = vector.multi_reduction <add>, %71, %cst_21 [1] : vector<8x8xf32> to vector<8xf32>
    %73 = vector.shape_cast %72 : vector<8xf32> to vector<8x1xf32>
    %74 = tpu.reciprocal %73 {approx = true} : vector<8x1xf32> -> vector<8x1xf32>
    %75 = vector.broadcast %74 : vector<8x1xf32> to vector<8x8xf32>
    %76 = arith.mulf %71, %75 : vector<8x8xf32>
    %77 = arith.truncf %76 : vector<8x8xf32> to vector<8x8xbf16>
    %cst_22 = arith.constant dense<0.000000e+00> : vector<8x8xf32>
    %78 = tpu.matmul %77, %62, %cst_22 {dimension_numbers = #tpu.dot_dimension_numbers<[1], [0], [0], [1], [0, 0, 1, 1], [], []>} : vector<8x8xbf16>, vector<8x8xbf16>, vector<8x8xf32> -> vector<8x8xf32>
    %79 = vector.extract_strided_slice %10 {offsets = [0, 24], sizes = [8, 8], strides = [1, 1]} : vector<8x32xf32> to vector<8x8xf32>
    %80 = arith.truncf %79 : vector<8x8xf32> to vector<8x8xbf16>
    %81 = vector.extract_strided_slice %11 {offsets = [0, 24], sizes = [8, 8], strides = [1, 1]} : vector<8x32xf32> to vector<8x8xf32>
    %82 = arith.truncf %81 : vector<8x8xf32> to vector<8x8xbf16>
    %83 = vector.extract_strided_slice %12 {offsets = [0, 24], sizes = [8, 8], strides = [1, 1]} : vector<8x32xf32> to vector<8x8xf32>
    %84 = arith.truncf %83 : vector<8x8xf32> to vector<8x8xbf16>
    %cst_23 = arith.constant dense<0.000000e+00> : vector<8x8xf32>
    %85 = tpu.matmul %80, %82, %cst_23 {dimension_numbers = #tpu.dot_dimension_numbers<[1], [1], [0], [0], [0, 0, 1, 0], [], []>} : vector<8x8xbf16>, vector<8x8xbf16>, vector<8x8xf32> -> vector<8x8xf32>
    %cst_24 = arith.constant 0.353553385 : f32
    %86 = vector.broadcast %cst_24 : f32 to vector<8x8xf32>
    %87 = arith.mulf %85, %86 : vector<8x8xf32>
    %88 = arith.addf %87, %0 : vector<8x8xf32>
    %cst_25 = arith.constant dense<0xFF800000> : vector<8xf32>
    %89 = vector.multi_reduction <maximumf>, %88, %cst_25 [1] : vector<8x8xf32> to vector<8xf32>
    %90 = vector.shape_cast %89 : vector<8xf32> to vector<8x1xf32>
    %91 = vector.broadcast %90 : vector<8x1xf32> to vector<8x8xf32>
    %92 = arith.subf %88, %91 : vector<8x8xf32>
    %93 = math.exp %92 : vector<8x8xf32>
    %cst_26 = arith.constant dense<0.000000e+00> : vector<8xf32>
    %94 = vector.multi_reduction <add>, %93, %cst_26 [1] : vector<8x8xf32> to vector<8xf32>
    %95 = vector.shape_cast %94 : vector<8xf32> to vector<8x1xf32>
    %96 = tpu.reciprocal %95 {approx = true} : vector<8x1xf32> -> vector<8x1xf32>
    %97 = vector.broadcast %96 : vector<8x1xf32> to vector<8x8xf32>
    %98 = arith.mulf %93, %97 : vector<8x8xf32>
    %99 = arith.truncf %98 : vector<8x8xf32> to vector<8x8xbf16>
    %cst_27 = arith.constant dense<0.000000e+00> : vector<8x8xf32>
    %100 = tpu.matmul %99, %84, %cst_27 {dimension_numbers = #tpu.dot_dimension_numbers<[1], [0], [0], [1], [0, 0, 1, 1], [], []>} : vector<8x8xbf16>, vector<8x8xbf16>, vector<8x8xf32> -> vector<8x8xf32>
    %101 = tpu.concatenate %34, %56, %78, %100 in 1 : vector<8x8xf32>, vector<8x8xf32>, vector<8x8xf32>, vector<8x8xf32> -> vector<8x32xf32>
    %c0_28 = arith.constant 0 : index
    %c0_29 = arith.constant 0 : index
    %102 = vector.load %arg4[%c0_28, %c0_29] : memref<32x32xf32, #tpu.memory_space<vmem>>, vector<32x32xf32>
    %103 = arith.truncf %101 : vector<8x32xf32> to vector<8x32xbf16>
    %104 = arith.truncf %102 : vector<32x32xf32> to vector<32x32xbf16>
    %cst_30 = arith.constant dense<0.000000e+00> : vector<8x32xf32>
    %105 = tpu.matmul %103, %104, %cst_30 {dimension_numbers = #tpu.dot_dimension_numbers<[1], [0], [0], [1], [0, 0, 1, 1], [], []>} : vector<8x32xbf16>, vector<32x32xbf16>, vector<8x32xf32> -> vector<8x32xf32>
    %c0_31 = arith.constant 0 : index
    %c0_32 = arith.constant 0 : index
    %106 = vector.load %arg5[%c0_31, %c0_32] : memref<1x32xf32, #tpu.memory_space<vmem>>, vector<1x32xf32>
    %107 = vector.broadcast %106 : vector<1x32xf32> to vector<8x32xf32>
    %108 = arith.addf %105, %107 : vector<8x32xf32>
    %c0_33 = arith.constant 0 : index
    %c0_34 = arith.constant 0 : index
    %109 = vector.load %arg6[%c0_33, %c0_34] : memref<1x32xf32, #tpu.memory_space<vmem>>, vector<1x32xf32>
    %c0_35 = arith.constant 0 : index
    %c0_36 = arith.constant 0 : index
    %110 = vector.load %arg7[%c0_35, %c0_36] : memref<1x32xf32, #tpu.memory_space<vmem>>, vector<1x32xf32>
    %111 = arith.addf %2, %108 : vector<8x32xf32>
    %cst_37 = arith.constant dense<0.000000e+00> : vector<8xf32>
    %112 = vector.multi_reduction <add>, %111, %cst_37 [1] : vector<8x32xf32> to vector<8xf32>
    %113 = vector.shape_cast %112 : vector<8xf32> to vector<8x1xf32>
    %cst_38 = arith.constant 3.200000e+01 : f32
    %114 = vector.broadcast %cst_38 : f32 to vector<8x1xf32>
    %115 = arith.divf %113, %114 : vector<8x1xf32>
    %116 = vector.broadcast %115 : vector<8x1xf32> to vector<8x32xf32>
    %117 = arith.subf %111, %116 : vector<8x32xf32>
    %118 = arith.mulf %117, %117 : vector<8x32xf32>
    %cst_39 = arith.constant dense<0.000000e+00> : vector<8xf32>
    %119 = vector.multi_reduction <add>, %118, %cst_39 [1] : vector<8x32xf32> to vector<8xf32>
    %120 = vector.shape_cast %119 : vector<8xf32> to vector<8x1xf32>
    %cst_40 = arith.constant 3.200000e+01 : f32
    %121 = vector.broadcast %cst_40 : f32 to vector<8x1xf32>
    %122 = arith.divf %120, %121 : vector<8x1xf32>
    %123 = vector.broadcast %115 : vector<8x1xf32> to vector<8x32xf32>
    %124 = arith.subf %111, %123 : vector<8x32xf32>
    %cst_41 = arith.constant 9.99999974E-6 : f32
    %125 = vector.broadcast %cst_41 : f32 to vector<8x1xf32>
    %126 = arith.addf %122, %125 : vector<8x1xf32>
    %127 = math.rsqrt %126 : vector<8x1xf32>
    %128 = vector.broadcast %127 : vector<8x1xf32> to vector<8x32xf32>
    %129 = arith.mulf %124, %128 : vector<8x32xf32>
    %130 = vector.broadcast %109 : vector<1x32xf32> to vector<8x32xf32>
    %131 = arith.mulf %129, %130 : vector<8x32xf32>
    %132 = vector.broadcast %110 : vector<1x32xf32> to vector<8x32xf32>
    %133 = arith.addf %131, %132 : vector<8x32xf32>
    %c0_42 = arith.constant 0 : index
    %c0_43 = arith.constant 0 : index
    %c0_44 = arith.constant 0 : index
    %134 = vector.load %arg9[%c0_42, %c0_43, %c0_44] : memref<1x8x32xf32, #tpu.memory_space<vmem>>, vector<1x8x32xf32>
    %135 = vector.shape_cast %134 : vector<1x8x32xf32> to vector<8x32xf32>
    %136 = vector.shape_cast %133 : vector<8x32xf32> to vector<1x8x32xf32>
    tpu.vector_store %arg9[%c0_42, %c0_43, %c0_44], %136 {strides = array<i32>} : memref<1x8x32xf32, #tpu.memory_space<vmem>>, vector<1x8x32xf32>,
    return
  }
  func.func @transform_0(%arg0: i32) -> (i32, i32, i32) {
    %c0_i32 = arith.constant 0 : i32
    %c0_i32_0 = arith.constant 0 : i32
    %c0_i32_1 = arith.constant 0 : i32
    return %arg0, %c0_i32, %c0_i32_0 : i32, i32, i32
  }
  func.func @transform_1(%arg0: i32) -> (i32, i32) {
    %c0_i32 = arith.constant 0 : i32
    %c0_i32_0 = arith.constant 0 : i32
    %c0_i32_1 = arith.constant 0 : i32
    return %c0_i32, %c0_i32_0 : i32, i32
  }
  func.func @transform_2(%arg0: i32) -> (i32, i32) {
    %c0_i32 = arith.constant 0 : i32
    %c0_i32_0 = arith.constant 0 : i32
    %c0_i32_1 = arith.constant 0 : i32
    return %c0_i32, %c0_i32_0 : i32, i32
  }
  func.func @transform_3(%arg0: i32) -> (i32, i32) {
    %c0_i32 = arith.constant 0 : i32
    %c0_i32_0 = arith.constant 0 : i32
    %c0_i32_1 = arith.constant 0 : i32
    return %c0_i32, %c0_i32_0 : i32, i32
  }
  func.func @transform_4(%arg0: i32) -> (i32, i32) {
    %c0_i32 = arith.constant 0 : i32
    %c0_i32_0 = arith.constant 0 : i32
    %c0_i32_1 = arith.constant 0 : i32
    return %c0_i32, %c0_i32_0 : i32, i32
  }
  func.func @transform_5(%arg0: i32) -> (i32, i32) {
    %c0_i32 = arith.constant 0 : i32
    %c0_i32_0 = arith.constant 0 : i32
    %c0_i32_1 = arith.constant 0 : i32
    return %c0_i32, %c0_i32_0 : i32, i32
  }
  func.func @transform_6(%arg0: i32) -> (i32, i32) {
    %c0_i32 = arith.constant 0 : i32
    %c0_i32_0 = arith.constant 0 : i32
    %c0_i32_1 = arith.constant 0 : i32
    return %c0_i32, %c0_i32_0 : i32, i32
  }
  func.func @transform_7(%arg0: i32) -> (i32, i32) {
    %c0_i32 = arith.constant 0 : i32
    %c0_i32_0 = arith.constant 0 : i32
    %c0_i32_1 = arith.constant 0 : i32
    return %c0_i32, %c0_i32_0 : i32, i32
  }
  func.func @transform_8(%arg0: i32) -> (i32, i32, i32) {
    %c0_i32 = arith.constant 0 : i32
    %c0_i32_0 = arith.constant 0 : i32
    %c0_i32_1 = arith.constant 0 : i32
    return %arg0, %c0_i32, %c0_i32_0 : i32, i32, i32
  }
}

</mosaic_0001>

<bundles_post_ra>
// kernel: tpu_custom_call.1
= control target key start
LH: loop header
LB: loop body
LE: loop exit
PB: predicated region body
PF: predicated region fallthrough
CT: control target
= control target key end

     0   :  { %13 = vsyncpa [#allocation3], 0  ;;  %s1843_s0 = inlined_call_operand.hbm [shape: f32[2,8,32], index: 0, kind: input, shape index: {}]   ;;  %s1844_s1 = inlined_call_operand.hbm [shape: f32[32,96], index: 1, kind: input, shape index: {}]   ;;  %s1845_s2 = inlined_call_operand.vmem [shape: f32[1,96], index: 2, kind: input, shape index: {}]   ;;  %s1846_s3 = inlined_call_operand.hbm [shape: f32[32,32], index: 3, kind: input, shape index: {}]   ;;  %s1847_s4 = inlined_call_operand.vmem [shape: f32[1,32], index: 4, kind: input, shape index: {}]   ;;  %s1848_s5 = inlined_call_operand.vmem [shape: f32[1,32], index: 5, kind: input, shape index: {}]   ;;  %s1849_s6 = inlined_call_operand.vmem [shape: f32[1,32], index: 6, kind: input, shape index: {}]   ;;  %s1850_s7 = inlined_call_operand.vmem [shape: f32[8,8], index: 7, kind: input, shape index: {}]   ;;  %s1851_s8 = inlined_call_operand.hbm [shape: f32[2,8,32], index: 8, kind: output, shape index: {}]  }
   0x1   :  { %15 = vsyncpa [#allocation3 + $0x1], 0 }
   0x2   :  { %16 = vsyncpa [#allocation6], 0 }
   0x3   :  { %17 = vsyncpa [#allocation4], 0 }
   0x4   :  { %19 = vsyncpa [#allocation4 + $0x1], 0  ;;  %s1514_s27 = smov 0   ;;  %s1516_s28 = smov 0  }
   0x5   :  { %s1518_s29 = smov 0   ;;  %s1520_s30 = smov 0  }
   0x6 LB: > { %s1535_s9 = sadd.s32 4294967295, %s1445_s30   ;;  %s1070_s10 = sadd.s32 4294967294, %s1445_s30   ;;  %s1445_s30 = sphi %s1520_s30, %s1871_s30   ;;  %s1441_s29 = sphi %s1518_s29, %s1870_s29   ;;  %s1437_s28 = sphi %s1516_s28, %s1869_s28   ;;  %s1433_s27 = sphi %s1514_s27, %s1868_s27  }
   0x7   : > { %p45_p0 = scmp.ne.s32.totalorder %s1437_s28, %s1433_s27  ;;  %p1852_p1 = scmp.eq.s32.totalorder %s1535_s9, 0 }
   0x8   : > { %p222_p3 = scmp.eq.s32.totalorder %s1070_s10, 1  ;;  %p1071_p5 = scmp.ge.s32.totalorder %s1445_s30, 1 }
   0x9   : > { %p1544_p4 = por %p1852_p1, %p45_p0  ;;  %p229_p7 = scmp.lt.s32.totalorder %s1445_s30, 3 }
   0xa   : > { %p1549_p6 = por %p222_p3, %p45_p0  ;;  %s1447_s14 = smov [#allocation5]  }
   0xb   : > { %s1855_s11 = scalar_select %p1544_p4, 1, 0 }
   0xc   : > { %s1856_s12 = scalar_select %p1549_p6, 1, 0 }
   0xd   : > { %p1554_p8 = pnand %p1071_p5, %p229_p7  ;;  %s241_s15 = sshll.u32 %s1447_s14, 4  ;;  %s1558_s15 = int_to_ptr.vmem [resolvable:$true] %s241_s15 }
   0xe   : > { %s1448_s17 = smov [#allocation7]   ;;  %s1289_s21 = scalar_lea.hbm %s1844_s1, 512 }
   0xf   : > { %p1198_p9 = pneg %p1554_p8  ;;  %s257_s18 = sshll.u32 %s1448_s17, 4  ;;  %s1569_s18 = int_to_ptr.vmem [resolvable:$true] %s257_s18 }
  0x10   : > { %p1290_p12 = scmp.ne.s32.totalorder %s1844_s1, %s1289_s21  ;;  %p1296_p5 = scmp.lt.u32.totalorder %s1289_s21, %s1844_s1 }
  0x11   : > { %p1565_p11 = pnand %p1198_p9, %p1852_p1 }
  0x13   : > { %p1291_p13 = pneg %p1565_p11 }
  0x15   : > { %p1292_p0 = pnand %p1291_p13, %p1290_p12 }
  0x17   : > { %p1293_p3 = pneg %p1292_p0 }
  0x19   : > { %p1298_p7 = pnand %p1296_p5, %p1293_p3 }
  0x1b   : > { %1301 = shalt.err (!%p1298_p7)
}
  0x1c   : > { %s1302_s26 = scalar_lea.vmem %s1558_s15, 512  ;;  %p1310_p2 = scmp.lt.s32.totalorder %s1558_s15, %s1558_s15 }
  0x1d   : > { %p1303_p9 = scmp.ne.s32.totalorder %s1558_s15, %s1302_s26  ;;  %p1311_p12 = scmp.lt.s32.totalorder %s1302_s26, %s1302_s26 }
  0x1f   : > { %p1305_p10 = pnand %p1303_p9, %p1291_p13  ;;  %p1312_p0 = por %p1311_p12, %p1310_p2 }
  0x21   : > { %p1306_p1 = pneg %p1305_p10 }
  0x23   : > { %p1313_p6 = pnand %p1312_p0, %p1306_p1 }
  0x25   : > { %1316 = shalt.err (!%p1313_p6)
}
  0x26   : > { %s1449_s10 = smov 128   ;;  %s1450_s14 = smov 8  }
  0x27   : > { %1201 = dma.hbm_to_vmem [thread:$0]  (!%p1565_p11), %s1844_s1, 512, %s1558_s15, [#allocation6], %s1449_s10, %s1449_s10, %s1450_s14  }
  0x28   : > { %s1317_s22 = scalar_lea.hbm %s1846_s3, 512 }
  0x29   : > { %p1318_p2 = scmp.ne.s32.totalorder %s1846_s3, %s1317_s22  ;;  %p1324_p10 = scmp.lt.u32.totalorder %s1317_s22, %s1846_s3 }
  0x2b   : > { %p1320_p1 = pnand %p1318_p2, %p1291_p13 }
  0x2d   : > { %p1321_p6 = pneg %p1320_p1 }
  0x2f   : > { %p1326_p3 = pnand %p1324_p10, %p1321_p6 }
  0x31   : > { %1329 = shalt.err (!%p1326_p3)
}
  0x32   : > { %s1330_s15 = scalar_lea.vmem %s1569_s18, 512  ;;  %p1338_p12 = scmp.lt.s32.totalorder %s1569_s18, %s1569_s18 }
  0x33   : > { %p1331_p5 = scmp.ne.s32.totalorder %s1569_s18, %s1330_s15  ;;  %p1339_p0 = scmp.lt.s32.totalorder %s1330_s15, %s1330_s15 }
  0x35   : > { %p1333_p7 = pnand %p1331_p5, %p1291_p13  ;;  %p1340_p2 = por %p1339_p0, %p1338_p12 }
  0x37   : > { %p1334_p9 = pneg %p1333_p7 }
  0x39   : > { %p1341_p1 = pnand %p1340_p2, %p1334_p9 }
  0x3b   : > { %1344 = shalt.err (!%p1341_p1)
}
  0x3c   : > { %1204 = dma.hbm_to_vmem [thread:$0]  (!%p1565_p11), %s1846_s3, 512, %s1569_s18, [#allocation6], %s1449_s10, %s1449_s10, %s1450_s14  }
  0x3d   : > { %s1624_s20 = sadd.s32 1, %s1445_s30   ;;  %s32_s16 = sadd.s32 1, %s1441_s29 }
  0x3e   : > { %s29_s21 = ssub.s32 %s1445_s30, %s1624_s20  ;;  %p39_p13 = scmp.ne.s32.totalorder %s1441_s29, %s1437_s28 }
  0x3f   : > { %p30_p6 = scmp.eq.s32.totalorder %s29_s21, 0  ;;  %p40_p10 = scmp.eq.s32.totalorder %s1445_s30, 0 }
  0x40   : > { %p1859_p3 = scmp.eq.s32.totalorder %s1535_s9, 1  ;;  %p1215_p7 = scmp.lt.s32.totalorder %s1445_s30, 2 }
  0x41   : > { %s1640_s23 = scalar_select %p30_p6, %s1441_s29, %s32_s16  }
  0x42   : > { %p1634_p5 = por %p1859_p3, %p39_p13  ;;  %p41_p9 = por %p40_p10, %p39_p13 }
  0x43   : > { %s283_s24 = sand.u32 1, %s1441_s29   ;;  %s1076_s18 = sshll.u32 %s1445_s30, 7 }
  0x44   : > { %s1860_s22 = scalar_select %p1634_p5, 1, 0 }
  0x45   : > { %s1075_s25 = sshll.u32 %s283_s24, 3  ;;  %s1647_s26 = scalar_lea.hbm %s1843_s0, %s1076_s18 }
  0x46   : > { %s287_s15 = scalar_lea.vmem [#allocation2], %s1075_s25  ;;  %p1651_p11 = pnand %p1215_p7, %p41_p9 }
  0x47   : > { %s294_s17 = sshll.u32 %s287_s15, 4  ;;  %s284_s16 = scalar_lea.sflag [#allocation3], %s283_s24  ;;  %s1649_s17 = int_to_ptr.vmem [resolvable:$true] %s294_s17 }
  0x48   : > { %s1345_s21 = scalar_lea.hbm %s1647_s26, 128  ;;  %p1347_p0 = pneg %p1651_p11 }
  0x49   : > { %p1346_p12 = scmp.ne.s32.totalorder %s1647_s26, %s1345_s21  ;;  %s1350_s10 = scalar_lea.hbm %s1843_s0, 256 }
  0x4a   : > { %p1351_p13 = scmp.lt.u32.totalorder %s1647_s26, %s1843_s0  ;;  %p1352_p6 = scmp.lt.u32.totalorder %s1350_s10, %s1345_s21 }
  0x4b   : > { %p1348_p2 = pnand %p1347_p0, %p1346_p12  ;;  %p1354_p3 = scmp.lt.u32.totalorder %s1345_s21, %s1647_s26 }
  0x4c   : > { %p1353_p10 = por %p1352_p6, %p1351_p13 }
  0x4d   : > { %p1349_p1 = pneg %p1348_p2 }
  0x4e   : > { %p1355_p7 = por %p1354_p3, %p1353_p10 }
  0x50   : > { %p1356_p9 = pnand %p1355_p7, %p1349_p1 }
  0x52   : > { %1359 = shalt.err (!%p1356_p9)
}
  0x53   : > { %s1360_s24 = scalar_lea.vmem %s1649_s17, 128  ;;  %s1451_s18 = smov [#allocation2]  }
  0x54   : > { %p1361_p12 = scmp.ne.s32.totalorder %s1649_s17, %s1360_s24  ;;  %s1365_s25 = sshll.u32 %s1451_s18, 4  ;;  %s1366_s25 = int_to_ptr.vmem [resolvable:$false] %s1365_s25 }
  0x55   : > { %s1367_s14 = scalar_lea.vmem %s1366_s25, 256  ;;  %p1368_p4 = scmp.lt.s32.totalorder %s1649_s17, %s1366_s25 }
  0x56   : > { %p1363_p2 = pnand %p1361_p12, %p1347_p0  ;;  %p1369_p13 = scmp.lt.s32.totalorder %s1367_s14, %s1360_s24 }
  0x58   : > { %p1364_p5 = pneg %p1363_p2  ;;  %p1370_p6 = por %p1369_p13, %p1368_p4 }
  0x5a   : > { %p1371_p10 = pnand %p1370_p6, %p1364_p5 }
  0x5c   : > { %1374 = shalt.err (!%p1371_p10)
}
  0x5d   : > { %1208 = dma.hbm_to_vmem [thread:$0]  (!%p1651_p11), %s1647_s26, 128, %s1649_s17, %s284_s16  }
  0x5e   : > { %303 = sbr.rel (%p1554_p8) target bundleno = 1921 (0x781), region = 52  ;;  %s1683_s21 = sand.u32 (!%p1554_p8), 1, %s1437_s28  }
  0x5f   : > { %s1078_s10 = sshll.u32 (!%p1554_p8), %s1683_s21, 3  ;;  %s306_s15 = scalar_lea.sflag (!%p1554_p8), [#allocation3], %s1683_s21 }
  0x60   : > { %s309_s24 = scalar_lea.vmem (!%p1554_p8), [#allocation2], %s1078_s10  ;;  %p1862_p4 = scmp.ne.s32.totalorder (!%p1554_p8), %s1855_s11, 0 }
  0x65   : > { %1420 = dma.done.wait (%p1862_p4), %s306_s15, 128  }
  0x66   : > { %1422 = vsyncadd (%p1862_p4), %s306_s15, 4294967168  ;;  %p1863_p5 = scmp.eq.s32.totalorder %s1535_s9, 0 }
  0x68   : > { %1424 = dma.done.wait (%p1863_p5), [#allocation6], 1024   ;;  %p1864_p8 = pmov %p1863_p5 }
  0x69   : > { %v1452_v0 = vmov 0.0   ;;  %vm1453_vm0 = vmmov 0   ;;  %v353_v1 = vld [vmem:[#allocation5] sm:$0xff]  ;;  %v354_v2 = vld [vmem:[#allocation5 + $0x8] sm:$0xff]  ;;  %v355_v3 = vld [vmem:[#allocation5 + $0x10] sm:$0xff]  ;;  %vm367_vm1 = vcmask 261120  }
  0x6a   : > { %1426 = vsyncadd (%p1864_p8), [#allocation6], 4294966272  ;;  %1122 = vmatprep.subr.bf16.mxu0 %v1452_v0  ;;  %1126 = vmatprep.mubr.msk.bf16.mxu0 %vm1453_vm0, %v1452_v0  ;;  %v358_v4 = vpack.c.bf16 %v354_v2, %v353_v1  ;;  %v356_v5 = vld [vmem:[#allocation5 + $0x18] sm:$0xff]  ;;  %v1082_v9 = vld [vmem:[%s1845_s2] ss:$0 sm:$0xff]  ;;  %s1454_s26 = smov 120  }
  0x6b   : > { %1130 = vmatprep.subr.bf16.mxu1 %v1452_v0  ;;  %1132 = vmatprep.mubr.msk.bf16.mxu1 %vm1453_vm0, %v1452_v0  ;;  %v359_v6 = vpack.c.bf16 %v356_v5, %v355_v3  ;;  %v1703_v7 = vld [vmem:[%s309_s24] sm:$0xff]  ;;  %s1455_s17 = smov 96   ;;  %s1456_s19 = smov 80   ;;  %vm415_vm2 = vcmask 64512   ;;  %vm481_vm3 = vcmask 1043456   ;;  %vm874_vm4 = vcmask 130048  }
  0x6c   : > { %1123 = vmatpush3.bf16.msra.mxu0 %v358_v4  ;;  %v357_v8 = vpack.c.bf16 %v1703_v7, %v1703_v7  ;;  %s1457_s16 = smov 88   ;;  %s1458_s18 = smov 72   ;;  %v351_v28 = vld [vmem:[%s1850_s7] sm:$0xff]  ;;  %vm876_vm5 = vcmask 195584  }
  0x6d   : > { %1124 = vmatprep.subr.bf16.mxu0 %v1452_v0  ;;  %s1459_s25 = smov 112   ;;  %s1460_s14 = smov 104  }
  0x6e   : > { %s1461_s11 = smov 56   ;;  %s1462_s13 = smov 64  }
  0x6f   : > { %p1865_p0 = scmp.ne.s32.totalorder %s1860_s22, 0 }
  0x70   : > { %1125 = vmatpush3.bf16.msra.mxu0 %v359_v6 }
  0x71   : > { %1136 = vmatprep.subr.bf16.mxu0 %v1452_v0 }
  0x73   : > { %1127 = vmatmul.mubr.msk.bf16.vlgmr.msra.gmra.mrb[0].mxu0 %vm367_vm1, %v357_v8 }
  0x74   : > { %1138 = vmatprep.mubr.msk.bf16.mxu0 %vm1453_vm0, %v1452_v0 }
 0x146   : > { %v405_v10 = vpop.f32.mrb[0].mxu0 }
 0x147   : > { %v406_v11 = vadd.f32 %v1082_v9, %v405_v10  ;;  %v1128_v12 = vpop.f32.mrb[1].mxu0 }
 0x148   : > { %v408_v13 = vpop.f32.mrb[2].mxu0 }
 0x149   : > { %v1715_v14 = vpack.c.bf16 %v406_v11, %v406_v11  ;;  %v1129_v15 = vpop.f32.mrb[3].mxu0 }
 0x14b   : > { %525 = vrot.lane.b32.xlu1 %v1715_v14, %s1454_s26  ;;  %413 = vrot.lane.b32.xlu0 %v1715_v14, %s1455_s17  ;;  %s1463_s26 = smov 40   ;;  %s1464_s17 = smov 48  }
 0x14f   : > { %639 = vrot.lane.b32.xlu1 %v1715_v14, %s1456_s19  ;;  %527 = vrot.lane.b32.xlu0 %v1715_v14, %s1457_s16  ;;  %s1465_s19 = smov 8   ;;  %s1466_s16 = smov 16  }
 0x153   : > { %751 = vrot.lane.b32.xlu1 %v1715_v14, %s1458_s18  ;;  %637 = vrot.lane.b32.xlu0 %v1715_v14, %s1459_s25  ;;  %s1467_s18 = smov 24  }
 0x157   : > { %749 = vrot.lane.b32.xlu0 %v1715_v14, %s1460_s14  ;;  %s968_s14 = scalar_lea.sflag [#allocation4], %s1683_s21 }
 0x1bd   : > { %v414_v16 = vpop.permute.xlu0 %413  ;;  %v526_v19 = vpop.permute.xlu1 %525 }
 0x1be   : > { %v420_v17 = vsel %vm415_vm2, %v414_v16, 0 }
 0x1bf   : > { %1131 = vmatpush3.bf16.xpose.msra.mxu1 %v420_v17 }
 0x1c0   : > { %1142 = vmatprep.subr.bf16.mxu1 %v1452_v0 }
 0x1c1   : > { %v528_v18 = vpop.permute.xlu0 %527  ;;  %v640_v21 = vpop.permute.xlu1 %639 }
 0x1c2   : > { %v533_v20 = vsel %vm415_vm2, %v528_v18, 0  ;;  %v645_v22 = vsel %vm415_vm2, %v640_v21, 0 }
 0x1c5   : > { %v752_v23 = vpop.permute.xlu1 %751  ;;  %v638_v24 = vpop.permute.xlu0 %637 }
 0x1c6   : > { %1133 = vmatmul.mubr.msk.bf16.vlgmr.msra.gmra.mrb[0].mxu1 %vm415_vm2, %v1715_v14  ;;  %v757_v25 = vsel %vm415_vm2, %v752_v23, 0 }
 0x1c7   : > { %1143 = vmatpush3.bf16.xpose.msra.mxu1 %v533_v20  ;;  %1144 = vmatprep.mubr.msk.bf16.mxu1 %vm1453_vm0, %v1452_v0 }
 0x1c8   : > { %1154 = vmatprep.subr.bf16.mxu1 %v1452_v0 }
 0x1c9   : > { %v750_v26 = vpop.permute.xlu0 %749 }
 0x1ce   : > { %1145 = vmatmul.mubr.msk.bf16.vlgmr.msra.gmra.mrb[4].mxu1 %vm415_vm2, %v526_v19 }
 0x1cf   : > { %1155 = vmatpush3.bf16.xpose.msra.mxu1 %v645_v22  ;;  %1156 = vmatprep.mubr.msk.bf16.mxu1 %vm1453_vm0, %v1452_v0 }
 0x1d0   : > { %1166 = vmatprep.subr.bf16.mxu1 %v1452_v0 }
 0x1d6   : > { %1157 = vmatmul.mubr.msk.bf16.vlgmr.msra.gmra.mrb[8].mxu1 %vm415_vm2, %v638_v24 }
 0x1d7   : > { %1167 = vmatpush3.bf16.xpose.msra.mxu1 %v757_v25  ;;  %1168 = vmatprep.mubr.msk.bf16.mxu1 %vm1453_vm0, %v1452_v0 }
 0x1d8   : > { %1178 = vmatprep.subr.bf16.mxu1 %v1452_v0 }
 0x1de   : > { %1169 = vmatmul.mubr.msk.bf16.vlgmr.msra.gmra.mrb[12].mxu1 %vm415_vm2, %v750_v26 }
 0x1df   : > { %1182 = vmatprep.mubr.msk.bf16.mxu1 %vm1453_vm0, %v1452_v0 }
 0x299   : > { %v456_v27 = vpop.f32.mrb[0].mxu1 }
 0x29a   : > { %v462_v29 = vmul.f32 0.35355338, %v456_v27  ;;  %v1134_v30 = vpop.f32.mrb[1].mxu1 }
 0x29b   : > { %v459_v31 = vpop.f32.mrb[2].mxu1 }
 0x29c   : > { %v1135_v32 = vpop.f32.mrb[3].mxu1  ;;  %v463_v33 = vadd.f32 %v462_v29, %v351_v28 }
 0x29e   : > { %v464_v34 = vsel %vm415_vm2, %v463_v33, -inf }
 0x29f   : > { %465 = vmax.xlane.f32.xlu1 %v464_v34 }
 0x2a1   : > { %v569_v35 = vpop.f32.mrb[4].mxu1 }
 0x2a2   : > { %v575_v36 = vmul.f32 0.35355338, %v569_v35  ;;  %v1146_v37 = vpop.f32.mrb[5].mxu1 }
 0x2a3   : > { %v572_v38 = vpop.f32.mrb[6].mxu1 }
 0x2a4   : > { %v1147_v39 = vpop.f32.mrb[7].mxu1  ;;  %v576_v40 = vadd.f32 %v575_v36, %v351_v28 }
 0x2a6   : > { %v577_v41 = vsel %vm415_vm2, %v576_v40, -inf }
 0x2a7   : > { %578 = vmax.xlane.f32.xlu0 %v577_v41 }
 0x2a9   : > { %v681_v42 = vpop.f32.mrb[8].mxu1 }
 0x2aa   : > { %v687_v43 = vmul.f32 0.35355338, %v681_v42  ;;  %v1158_v44 = vpop.f32.mrb[9].mxu1 }
 0x2ab   : > { %v684_v45 = vpop.f32.mrb[10].mxu1 }
 0x2ac   : > { %v1159_v46 = vpop.f32.mrb[11].mxu1  ;;  %v688_v47 = vadd.f32 %v687_v43, %v351_v28 }
 0x2ad   : > { %v878_v46 = vld [vmem:[#allocation7] sm:$0xff] }
 0x2ae   : > { %v689_v48 = vsel %vm415_vm2, %v688_v47, -inf }
 0x2af   : > { %690 = vmax.xlane.f32.xlu0 %v689_v48 }
 0x2b1   : > { %v793_v49 = vpop.f32.mrb[12].mxu1 }
 0x2b2   : > { %v799_v50 = vmul.f32 0.35355338, %v793_v49  ;;  %v1170_v51 = vpop.f32.mrb[13].mxu1  ;;  %v880_v49 = vld [vmem:[#allocation7 + $0x10] sm:$0xff] }
 0x2b3   : > { %v796_v52 = vpop.f32.mrb[14].mxu1 }
 0x2b4   : > { %v1171_v53 = vpop.f32.mrb[15].mxu1  ;;  %v800_v54 = vadd.f32 %v799_v50, %v351_v28  ;;  %v881_v50 = vld [vmem:[#allocation7 + $0x18] sm:$0xff] }
 0x2b5   : > { %v884_v51 = vpack.c.bf16 %v881_v50, %v880_v49 }
 0x2b6   : > { %v801_v55 = vsel %vm415_vm2, %v800_v54, -inf }
 0x2b7   : > { %802 = vmax.xlane.f32.xlu1 %v801_v55 }
 0x32c   : > { %v466_v56 = vpop.xlane.xlu1 %465 }
 0x32d   : > { %v467_v57 = vsub.f32 %v463_v33, %v466_v56 }
 0x32f   : > { %v468_v58 = vmul.f32 1.442695, %v467_v57 }
 0x331   : > { %1271 = vpow2.f32 %v468_v58 }
 0x334   : > { %v579_v59 = vpop.xlane.xlu0 %578 }
 0x335   : > { %v580_v60 = vsub.f32 %v576_v40, %v579_v59 }
 0x337   : > { %v581_v61 = vmul.f32 1.442695, %v580_v60 }
 0x339   : > { %1273 = vpow2.f32 %v581_v61 }
 0x33b   : > { %v1272_v62 = vpop.eup %1271 }
 0x33c   : > { %v691_v63 = vpop.xlane.xlu0 %690  ;;  %v470_v1 = vsel %vm415_vm2, %v1272_v62, 0.0 }
 0x33d   : > { %v692_v2 = vsub.f32 %v688_v47, %v691_v63  ;;  %471 = vadd.xlane.f32.xlu0 %v470_v1  ;;  %v879_v47 = vld [vmem:[#allocation7 + $0x8] sm:$0xff] }
 0x33e   : > { %v883_v48 = vpack.c.bf16 %v879_v47, %v878_v46 }
 0x33f   : > { %v693_v3 = vmul.f32 1.442695, %v692_v2 }
 0x340   : > { %1179 = vmatpush3.bf16.msra.mxu1 %v883_v48 }
 0x341   : > { %1275 = vpow2.f32 %v693_v3  ;;  %1180 = vmatprep.subr.bf16.mxu1 %v1452_v0  ;;  %v1092_v3 = vld [vmem:[%s1847_s4] ss:$0 sm:$0xff] }
 0x343   : > { %v1274_v4 = vpop.eup %1273 }
 0x344   : > { %v583_v5 = vsel %vm415_vm2, %v1274_v4, 0.0  ;;  %v803_v9 = vpop.xlane.xlu1 %802  ;;  %1181 = vmatpush3.bf16.msra.mxu1 %v884_v51 }
 0x345   : > { %584 = vadd.xlane.f32.xlu1 %v583_v5  ;;  %v804_v10 = vsub.f32 %v800_v54, %v803_v9 }
 0x347   : > { %v805_v11 = vmul.f32 1.442695, %v804_v10 }
 0x349   : > { %1277 = vpow2.f32 %v805_v11 }
 0x34b   : > { %v1276_v6 = vpop.eup %1275 }
 0x34c   : > { %v695_v8 = vsel %vm415_vm2, %v1276_v6, 0.0 }
 0x34d   : > { %696 = vadd.xlane.f32.xlu0 %v695_v8 }
 0x353   : > { %v1278_v12 = vpop.eup %1277 }
 0x354   : > { %v807_v13 = vsel %vm415_vm2, %v1278_v12, 0.0 }
 0x356   : > { %589 = vrot.lane.b32.xlu1 %v1715_v14, %s1461_s11 }
 0x363   : > { %476 = vrot.lane.b32.xlu0 %v1715_v14, %s1462_s13 }
 0x367   : > { %813 = vrot.lane.b32.xlu0 %v1715_v14, %s1463_s26  ;;  %s1097_s26 = sshll.u32 %s1535_s9, 7  ;;  %s1468_s9 = smov [#allocation8]  }
 0x368   : > { %s1798_s25 = scalar_lea.hbm %s1851_s8, %s1097_s26 }
 0x37a   : > { %808 = vadd.xlane.f32.xlu1 %v807_v13 }
 0x38b   : > { %701 = vrot.lane.b32.xlu1 %v1715_v14, %s1464_s17  ;;  %s349_s17 = scalar_lea.vmem [#allocation8], %s1078_s10  ;;  %s1379_s10 = sshll.u32 %s1468_s9, 4  ;;  %s1380_s10 = int_to_ptr.vmem [resolvable:$false] %s1379_s10 }
 0x38c   : > { %s1381_s24 = scalar_lea.vmem %s1380_s10, 256 }
 0x3ca   : > { %v472_v15 = vpop.xlane.xlu0 %471 }
 0x3cb   : > { %1279 = vrcp.f32 %v472_v15 }
 0x3d2   : > { %v585_v16 = vpop.xlane.xlu1 %584 }
 0x3d3   : > { %1281 = vrcp.f32 %v585_v16 }
 0x3d5   : > { %v1280_v17 = vpop.eup %1279 }
 0x3d6   : > { %v474_v19 = vmul.f32 %v1280_v17, %v1272_v62  ;;  %v590_v22 = vpop.permute.xlu1 %589 }
 0x3d7   : > { %v595_v25 = vsel %vm481_vm3, %v590_v22, 0 }
 0x3d8   : > { %v475_v23 = vpack.c.bf16 %v474_v19, %v474_v19 }
 0x3da   : > { %v697_v18 = vpop.xlane.xlu0 %696 }
 0x3db   : > { %1283 = vrcp.f32 %v697_v18 }
 0x3dd   : > { %v1282_v24 = vpop.eup %1281 }
 0x3de   : > { %v477_v20 = vpop.permute.xlu0 %476  ;;  %v587_v14 = vmul.f32 %v1282_v24, %v1274_v4 }
 0x3df   : > { %v483_v21 = vsel %vm481_vm3, %v477_v20, 0 }
 0x3e0   : > { %1137 = vmatpush3.bf16.msra.mxu0 %v483_v21  ;;  %v588_v26 = vpack.c.bf16 %v587_v14, %v587_v14 }
 0x3e1   : > { %1148 = vmatprep.subr.bf16.mxu0 %v1452_v0 }
 0x3e2   : > { %v814_v32 = vpop.permute.xlu0 %813 }
 0x3e3   : > { %1139 = vmatmul.mubr.msk.bf16.vlgmr.msra.gmra.mrb[4].mxu0 %vm415_vm2, %v475_v23  ;;  %v819_v34 = vsel %vm481_vm3, %v814_v32, 0  ;;  %v1095_v23 = vld [vmem:[%s1849_s6] ss:$0 sm:$0xff] }
 0x3e4   : > { %1149 = vmatpush3.bf16.msra.mxu0 %v595_v25  ;;  %1150 = vmatprep.mubr.msk.bf16.mxu0 %vm1453_vm0, %v1452_v0 }
 0x3e5   : > { %1160 = vmatprep.subr.bf16.mxu0 %v1452_v0  ;;  %v1284_v27 = vpop.eup %1283 }
 0x3e6   : > { %v699_v29 = vmul.f32 %v1284_v27, %v1276_v6 }
 0x3e8   : > { %v700_v33 = vpack.c.bf16 %v699_v29, %v699_v29 }
 0x3eb   : > { %1151 = vmatmul.mubr.msk.bf16.vlgmr.msra.gmra.mrb[8].mxu0 %vm415_vm2, %v588_v26 }
 0x3ec   : > { %1162 = vmatprep.mubr.msk.bf16.mxu0 %vm1453_vm0, %v1452_v0 }
 0x407   : > { %v809_v28 = vpop.xlane.xlu1 %808 }
 0x408   : > { %1285 = vrcp.f32 %v809_v28 }
 0x40b   : > { %v702_v30 = vpop.permute.xlu1 %701 }
 0x40c   : > { %v707_v31 = vsel %vm481_vm3, %v702_v30, 0 }
 0x40d   : > { %1161 = vmatpush3.bf16.msra.mxu0 %v707_v31 }
 0x40e   : > { %1172 = vmatprep.subr.bf16.mxu0 %v1452_v0 }
 0x410   : > { %1163 = vmatmul.mubr.msk.bf16.vlgmr.msra.gmra.mrb[12].mxu0 %vm415_vm2, %v700_v33 }
 0x411   : > { %1173 = vmatpush3.bf16.msra.mxu0 %v819_v34  ;;  %1174 = vmatprep.mubr.msk.bf16.mxu0 %vm1453_vm0, %v1452_v0 }
 0x412   : > { %v1286_v35 = vpop.eup %1285 }
 0x413   : > { %v811_v36 = vmul.f32 %v1286_v35, %v1278_v12 }
 0x415   : > { %v812_v37 = vpack.c.bf16 %v811_v36, %v811_v36 }
 0x418   : > { %1175 = vmatmul.mubr.msk.bf16.vlgmr.msra.gmra.mrb[16].mxu0 %vm415_vm2, %v812_v37 }
 0x4b6   : > { %v519_v38 = vpop.f32.mrb[4].mxu0 }
 0x4b7   : > { %v1140_v39 = vpop.f32.mrb[5].mxu0 }
 0x4b8   : > { %v522_v40 = vpop.f32.mrb[6].mxu0 }
 0x4b9   : > { %v1141_v41 = vpop.f32.mrb[7].mxu0 }
 0x4be   : > { %v631_v42 = vpop.f32.mrb[8].mxu0 }
 0x4bf   : > { %862 = vrot.lane.b32.xlu1 %v631_v42, %s1465_s19  ;;  %v1152_v43 = vpop.f32.mrb[9].mxu0  ;;  %s981_s19 = sshll.u32 %s349_s17, 4  ;;  %s1800_s19 = int_to_ptr.vmem [resolvable:$true] %s981_s19 }
 0x4c0   : > { %v634_v44 = vpop.f32.mrb[10].mxu0  ;;  %s1375_s15 = scalar_lea.vmem %s1800_s19, 128  ;;  %p1382_p7 = scmp.lt.s32.totalorder %s1800_s19, %s1380_s10 }
 0x4c1   : > { %v1153_v45 = vpop.f32.mrb[11].mxu0  ;;  %p1376_p11 = scmp.ne.s32.totalorder %s1800_s19, %s1375_s15  ;;  %p1383_p9 = scmp.lt.s32.totalorder %s1381_s24, %s1375_s15 }
 0x4c3   : > { %p1377_p1 = pnand %p1376_p11, %p1865_p0  ;;  %p1384_p12 = por %p1383_p9, %p1382_p7 }
 0x4c5   : > { %p1378_p3 = pneg %p1377_p1 }
 0x4c7   : > { %p1385_p2 = pnand %p1384_p12, %p1378_p3 }
 0x4e3   : > { %v743_v52 = vpop.f32.mrb[12].mxu0 }
 0x4e4   : > { %866 = vrot.lane.b32.xlu0 %v743_v52, %s1466_s16  ;;  %v1164_v53 = vpop.f32.mrb[13].mxu0 }
 0x4e5   : > { %v746_v54 = vpop.f32.mrb[14].mxu0 }
 0x4e6   : > { %v1165_v55 = vpop.f32.mrb[15].mxu0 }
 0x4eb   : > { %v855_v56 = vpop.f32.mrb[16].mxu0 }
 0x4ec   : > { %870 = vrot.lane.b32.xlu1 %v855_v56, %s1467_s18  ;;  %v1176_v57 = vpop.f32.mrb[17].mxu0 }
 0x4ed   : > { %v858_v58 = vpop.f32.mrb[18].mxu0 }
 0x4ee   : > { %v1177_v59 = vpop.f32.mrb[19].mxu0 }
 0x531   : > { %v863_v60 = vpop.permute.xlu1 %862 }
 0x532   : > { %v873_v0 = vsel %vm415_vm2, %v519_v38, %v863_v60 }
 0x556   : > { %v867_v61 = vpop.permute.xlu0 %866 }
 0x557   : > { %v875_v62 = vsel %vm874_vm4, %v873_v0, %v867_v61 }
 0x55e   : > { %v871_v63 = vpop.permute.xlu1 %870 }
 0x55f   : > { %v877_v1 = vsel %vm876_vm5, %v875_v62, %v871_v63 }
 0x560   : > { %v882_v2 = vpack.c.bf16 %v877_v1, %v877_v1 }
 0x562   : > { %1183 = vmatmul.mubr.msk.bf16.vlgmr.msra.gmra.mrb[16].mxu1 %vm367_vm1, %v882_v2 }
 0x635   : > { %v929_v4 = vpop.f32.mrb[16].mxu1 }
 0x636   : > { %v930_v5 = vadd.f32 %v1092_v3, %v929_v4  ;;  %v1184_v6 = vpop.f32.mrb[17].mxu1 }
 0x637   : > { %v932_v8 = vpop.f32.mrb[18].mxu1 }
 0x638   : > { %v1185_v9 = vpop.f32.mrb[19].mxu1  ;;  %v937_v10 = vadd.f32 %v930_v5, %v1703_v7  ;;  %v1094_v7 = vld [vmem:[%s1848_s5] ss:$0 sm:$0xff] }
 0x63a   : > { %v938_v11 = vsel %vm367_vm1, %v937_v10, 0.0 }
 0x63b   : > { %939 = vadd.xlane.f32.xlu0 %v938_v11 }
 0x6c8   : > { %v940_v12 = vpop.xlane.xlu0 %939 }
 0x6c9   : > { %v942_v13 = vmul.f32 0.03125, %v940_v12 }
 0x6cb   : > { %v943_v15 = vsub.f32 %v937_v10, %v942_v13 }
 0x6cd   : > { %v944_v16 = vmul.f32 %v943_v15, %v943_v15 }
 0x6cf   : > { %v945_v17 = vsel %vm367_vm1, %v944_v16, 0.0 }
 0x6d0   : > { %946 = vadd.xlane.f32.xlu1 %v945_v17 }
 0x75d   : > { %v947_v18 = vpop.xlane.xlu1 %946 }
 0x75e   : > { %v948_v19 = vmul.f32 0.03125, %v947_v18 }
 0x760   : > { %v949_v20 = vadd.f32 1e-05, %v948_v19 }
 0x762   : > { %1287 = vrsqrt.f32 %v949_v20 }
 0x76c   : > { %v1288_v21 = vpop.eup %1287 }
 0x76d   : > { %v951_v22 = vmul.f32 %v1288_v21, %v943_v15 }
 0x76f   : > { %v958_v24 = vmul.f32 %v1094_v7, %v951_v22 }
 0x771   : > { %v965_v25 = vadd.f32 %v1095_v23, %v958_v24 }
 0x773   : > { %966 = vst.msk [vmem:[%s349_s17] sm:$0xff] %vm367_vm1, %v965_v25 }
 0x774   : > { %1388 = shalt.err (!%p1385_p2)
}
 0x775   : > { %s1389_s21 = scalar_lea.hbm %s1798_s25, 128  ;;  %s1393_s26 = scalar_lea.hbm %s1851_s8, 256 }
 0x776   : > { %p1390_p13 = scmp.ne.s32.totalorder %s1798_s25, %s1389_s21  ;;  %p1394_p4 = scmp.lt.u32.totalorder %s1798_s25, %s1851_s8 }
 0x777   : > { %p1395_p5 = scmp.lt.u32.totalorder %s1393_s26, %s1389_s21  ;;  %p1397_p11 = scmp.lt.u32.totalorder %s1389_s21, %s1798_s25 }
 0x778   : > { %p1391_p6 = pnand %p1390_p13, %p1865_p0 }
 0x779   : > { %p1396_p8 = por %p1395_p5, %p1394_p4 }
 0x77a   : > { %p1392_p10 = pneg %p1391_p6 }
 0x77b   : > { %p1398_p1 = por %p1397_p11, %p1396_p8 }
 0x77d   : > { %p1399_p3 = pnand %p1398_p1, %p1392_p10 }
 0x77f   : > { %1402 = shalt.err (!%p1399_p3)
}
 0x780   : > { %1196 = dma.vmem_to_hbm [thread:$0]  (%p1865_p0), %s1800_s19, 128, %s1798_s25, %s968_s14  }
 0x781 PF: > { %s993_s18 = sand.u32 1, %s1433_s27   ;;  %p1866_p7 = scmp.ne.s32.totalorder %s1856_s12, 0 }
 0x782   : > { %p1867_p9 = scmp.ge.s32.totalorder %s1445_s30, 2  ;;  %s994_s15 = scalar_lea.sflag [#allocation4], %s993_s18 }
 0x784   : > { %p1210_p12 = pnand %p1867_p9, %p1866_p7 }
 0x786   : > { %1428 = dma.done.wait (!%p1210_p12), %s994_s15, 128  }
 0x787   : > { %1430 = vsyncadd (!%p1210_p12), %s994_s15, 4294967168  ;;  %p22_p2 = scmp.ge.s32.totalorder %s1624_s20, 4   ;;  %s1868_s27 = smov %s1437_s28 }
 0x788   : > { %s1869_s28 = smov %s1441_s29  ;;  %s1870_s29 = smov %s1640_s23 }
 0x789   : > { %s1871_s30 = smov %s1624_s20  ;;  %24 = sbr.rel (!%p22_p2) target bundleno = 6 (0x6), region = 105 }
 0x790   :  { %999 = vsyncpa [#allocation3], 1 }
 0x791   :  { %1001 = vsyncpa [#allocation3 + $0x1], 1 }
 0x792   :  { %1002 = vsyncpa [#allocation6], 1 }
 0x793   :  { %1003 = vsyncpa [#allocation4], 1 }
 0x794   :  { %1005 = vsyncpa [#allocation4 + $0x1], 1 }

</bundles_post_ra>
